<compile_context>
chip_gen: v7x
topology: tpu7x:2x2x1
jax: 0.10.0
libtpu: 0.0.40
codegen_flags: <defaults>
</compile_context>

<pallas_src>
import functools

import jax
import jax.numpy as jnp
from jax.experimental import pallas as pl
from jax.experimental.pallas import tpu as pltpu

# Synthetic hyper-parameters (VOCAB_SIZE / COMPRESSED_VOCAB_SIZE are undefined
# constants in the original file; pick small TPU-friendly values).
VOCAB_SIZE = 256
COMPRESSED_VOCAB_SIZE = 128

_SUBLANE = 8    # f32 sublane count
_LANE = 128     # lane count


def _round_up(x, m):
    return ((x + m - 1) // m) * m


def _cost_estimate(B, V, C, x, w, b, out_dtype):
    return pl.CostEstimate(
        flops=2 * B * V * C,
        transcendentals=0,
        bytes_accessed=(
            B * V * x.dtype.itemsize
            + V * C * w.dtype.itemsize
            + C * b.dtype.itemsize
            + B * C * jnp.dtype(out_dtype).itemsize
        ),
    )


# ---------------- single-shot / W-resident kernel (no K reduction) ----------
def _linear_kernel(x_ref, w_ref, b_ref, o_ref):
    """One MXU pass + bias add; W (and bias) fully resident in VMEM."""
    x = x_ref[...]
    w = w_ref[...]
    if x.dtype != w.dtype:          # bf16 weights: cast activations (VPU, cheap)
        x = x.astype(w.dtype)
    acc = jnp.dot(x, w, preferred_element_type=jnp.float32)
    o_ref[...] = (acc + b_ref[...].astype(jnp.float32)).astype(o_ref.dtype)


# ---------------- tiled fallback kernels (large V*C only) -------------------
def _linear_tiled_f32_kernel(x_ref, w_ref, b_ref, o_ref):
    """f32 output: accumulate directly into o_ref (no scratch, no final copy)."""
    k = pl.program_id(2)

    @pl.when(k == 0)
    def _():
        o_ref[...] = jnp.broadcast_to(
            b_ref[...].astype(jnp.float32), o_ref.shape
        )

    x = x_ref[...]
    w = w_ref[...]
    if x.dtype != w.dtype:
        x = x.astype(w.dtype)
    o_ref[...] += jnp.dot(x, w, preferred_element_type=jnp.float32)


def _linear_tiled_acc_kernel(x_ref, w_ref, b_ref, o_ref, acc_ref):
    """Low-precision output: f32 accumulator scratch, cast on the last K step."""
    k = pl.program_id(2)

    @pl.when(k == 0)
    def _():
        acc_ref[...] = jnp.broadcast_to(
            b_ref[...].astype(jnp.float32), acc_ref.shape
        )

    x = x_ref[...]
    w = w_ref[...]
    if x.dtype != w.dtype:
        x = x.astype(w.dtype)
    acc_ref[...] += jnp.dot(x, w, preferred_element_type=jnp.float32)

    @pl.when(k == pl.num_programs(2) - 1)
    def _():
        o_ref[...] = acc_ref[...].astype(o_ref.dtype)


@functools.partial(
    jax.jit,
    static_argnames=(
        "tm", "tn", "tk", "single_shot_vmem_bytes", "w_resident_vmem_bytes"
    ),
)
def action_encoder_forward(
    x, w, b, *,
    tm=512, tn=512, tk=512,
    single_shot_vmem_bytes=4 << 20,      # whole-problem-in-VMEM threshold
    w_resident_vmem_bytes=36 << 20,      # per-step footprint budget (safe on v7x)
):
    """y = x @ w + b   (x: (B, V), w: (V, C), b: (1, C)) -> (B, C)."""
    B, V = x.shape
    Vw, C = w.shape
    assert Vw == V
    assert b.shape == (1, C)
    out_dtype = x.dtype
    xi, wi, bi, oi = (x.dtype.itemsize, w.dtype.itemsize,
                      b.dtype.itemsize, jnp.dtype(out_dtype).itemsize)
    cost = _cost_estimate(B, V, C, x, w, b, out_dtype)

    # ---- path 1: single-shot, grid-free (shipped tiny shapes) --------------
    # No padding / slicing: the partial (B<8)-row store is a masked vst,
    # far cheaper than extra XLA ops when the kernel is launch-latency bound.
    total_bytes = B * V * xi + V * C * wi + _SUBLANE * C * bi + B * C * oi
    if total_bytes <= single_shot_vmem_bytes:
        return pl.pallas_call(
            _linear_kernel,
            out_shape=jax.ShapeDtypeStruct((B, C), out_dtype),
            cost_estimate=cost,
        )(x, w, b)

    # ---- path 2: W-resident, 1-D grid over batch (realistic regime) --------
    w_res_bytes = 2 * V * C * wi + 2 * _SUBLANE * C * bi   # conservative 2x
    per_row_bytes = 2 * (V * xi + C * oi)                  # double-buffered x/out
    if w_res_bytes + _SUBLANE * per_row_bytes <= w_resident_vmem_bytes:
        tm_max = (w_resident_vmem_bytes - w_res_bytes) // per_row_bytes
        tm_eff = min(tm, tm_max, _round_up(B, _SUBLANE))
        tm_eff = max(_SUBLANE, (tm_eff // _SUBLANE) * _SUBLANE)
        grid = (pl.cdiv(B, tm_eff),)
        footprint = w_res_bytes + tm_eff * per_row_bytes
        vmem_limit = int(min(max(2 * footprint, 24 << 20), 48 << 20))
        return pl.pallas_call(
            _linear_kernel,
            out_shape=jax.ShapeDtypeStruct((B, C), out_dtype),
            grid_spec=pltpu.PrefetchScalarGridSpec(
                num_scalar_prefetch=0,
                grid=grid,
                in_specs=[
                    pl.BlockSpec((tm_eff, V), lambda i: (i, 0)),  # stream x tiles
                    pl.BlockSpec((V, C), lambda i: (0, 0)),       # W resident
                    pl.BlockSpec((1, C), lambda i: (0, 0)),       # bias resident
                ],
                out_specs=pl.BlockSpec((tm_eff, C), lambda i: (i, 0)),
            ),
            compiler_params=pltpu.CompilerParams(
                dimension_semantics=("parallel",),
                vmem_limit_bytes=vmem_limit,
            ),
            cost_estimate=cost,
        )(x, w, b)

    # ---- path 3: fully tiled M/N/K fallback (very large V*C) ---------------
    tm_eff = min(tm, _round_up(B, _SUBLANE))
    tm_eff = max(_SUBLANE, (tm_eff // _SUBLANE) * _SUBLANE)

    if C % _LANE == 0:
        tn_eff = _round_up(min(tn, C), _LANE)   # partial N blocks are safe
    else:
        tn_eff = C                              # single N block (lane dim == full)

    if V % _LANE == 0:
        tk_cap = min(tk, V)
        divisors = [d for d in range(_LANE, tk_cap + 1, _LANE) if V % d == 0]
        tk_eff = max(divisors) if divisors else V   # tk must divide V exactly
    else:
        tk_eff = V                                  # no K tiling if unaligned

    grid = (pl.cdiv(B, tm_eff), pl.cdiv(C, tn_eff), V // tk_eff)

    use_scratch = jnp.dtype(out_dtype) != jnp.dtype(jnp.float32)
    scratch = ([pltpu.VMEM((tm_eff, tn_eff), jnp.float32)] if use_scratch else [])
    kernel = _linear_tiled_acc_kernel if use_scratch else _linear_tiled_f32_kernel

    footprint = 2 * (tm_eff * tk_eff * xi + tk_eff * tn_eff * wi
                     + _SUBLANE * tn_eff * bi + tm_eff * tn_eff * oi)
    if use_scratch:
        footprint += tm_eff * tn_eff * 4
    vmem_limit = int(min(max(2 * footprint, 24 << 20), 48 << 20))

    return pl.pallas_call(
        kernel,
        out_shape=jax.ShapeDtypeStruct((B, C), out_dtype),
        grid_spec=pltpu.PrefetchScalarGridSpec(
            num_scalar_prefetch=0,
            grid=grid,
            in_specs=[
                pl.BlockSpec((tm_eff, tk_eff), lambda i, j, k: (i, k)),  # x M/K
                pl.BlockSpec((tk_eff, tn_eff), lambda i, j, k: (k, j)),  # w K/N
                pl.BlockSpec((1, tn_eff), lambda i, j, k: (0, j)),       # bias N
            ],
            out_specs=pl.BlockSpec((tm_eff, tn_eff), lambda i, j, k: (i, j)),
            scratch_shapes=scratch,
        ),
        compiler_params=pltpu.CompilerParams(
            dimension_semantics=("parallel", "parallel", "arbitrary"),
            vmem_limit_bytes=vmem_limit,
        ),
        cost_estimate=cost,
    )(x, w, b)


def init_action_encoder_params(key, in_features, out_features,
                               weight_dtype=jnp.float32):
    """torch.nn.Linear default init (uniform +-1/sqrt(in)).

    Weight is stored transposed, (in, out).  For large deployments store the
    weight in bfloat16 (halves HBM traffic; f32 accumulation preserved).
    """
    k_w, k_b = jax.random.split(key)
    bound = 1.0 / (in_features ** 0.5)
    w = jax.random.uniform(
        k_w, (in_features, out_features), jnp.float32, -bound, bound
    ).astype(weight_dtype)
    b = jax.random.uniform(k_b, (1, out_features), jnp.float32, -bound, bound)
    return w, b


if __name__ == "__main__":
    key = jax.random.PRNGKey(0)
    k1, k2, k3, k4, k5, k6 = jax.random.split(key, 6)

    # 1) Shipped tiny shape, f32 — single-shot grid-free path (no pad/slice).
    B = 2
    x = jax.random.normal(k1, (B, VOCAB_SIZE), jnp.float32)
    w, b = init_action_encoder_params(k2, VOCAB_SIZE, COMPRESSED_VOCAB_SIZE)
    y = action_encoder_forward(x, w, b)
    jax.block_until_ready(y)
    y_ref = x @ w + b
    assert y.shape == (B, COMPRESSED_VOCAB_SIZE)
    assert jnp.allclose(y, y_ref, atol=1e-5, rtol=1e-5)

    # 2) W-resident 1-D-grid path with bf16 weights (larger-batch regime).
    B2 = 64
    x2 = jax.random.normal(k3, (B2, VOCAB_SIZE), jnp.float32)
    w2, b2 = init_action_encoder_params(
        k4, VOCAB_SIZE, COMPRESSED_VOCAB_SIZE, weight_dtype=jnp.bfloat16
    )
    y2 = action_encoder_forward(x2, w2, b2, single_shot_vmem_bytes=0)
    jax.block_until_ready(y2)
    y2_ref = x2.astype(jnp.bfloat16).astype(jnp.float32) @ w2.astype(jnp.float32) + b2
    assert y2.shape == (B2, COMPRESSED_VOCAB_SIZE)
    assert jnp.allclose(y2, y2_ref, atol=1e-3, rtol=1e-3)

    # 3) Fully tiled M/N/K fallback (forced), f32 accumulate-into-output.
    B3, V3, C3 = 64, 512, 256
    x3 = jax.random.normal(k5, (B3, V3), jnp.float32)
    w3, b3 = init_action_encoder_params(k6, V3, C3)
    y3 = action_encoder_forward(
        x3, w3, b3, tm=32, tn=128, tk=128,
        single_shot_vmem_bytes=0, w_resident_vmem_bytes=0,
    )
    jax.block_until_ready(y3)
    y3_ref = x3 @ w3 + b3
    assert y3.shape == (B3, C3)
    assert jnp.allclose(y3, y3_ref, atol=2e-4, rtol=1e-4)

    print("KERNEL_OK")
</pallas_src>

<mosaic_0001>
module attributes {stable_mosaic.version = 11 : i64} {
  func.func @_linear_kernel(%arg0: memref<2x256xf32, #tpu.memory_space<vmem>>, %arg1: memref<256x128xf32, #tpu.memory_space<vmem>>, %arg2: memref<1x128xf32, #tpu.memory_space<vmem>>, %arg3: memref<2x128xf32, #tpu.memory_space<vmem>>) attributes {dimension_semantics = [], scalar_prefetch = 0 : i64, scratch_operands = 0 : i64, tpu.core_type = #tpu.core_type<tc>} {
    %c0 = arith.constant 0 : index
    %c0_0 = arith.constant 0 : index
    %0 = vector.load %arg0[%c0, %c0_0] : memref<2x256xf32, #tpu.memory_space<vmem>>, vector<2x256xf32>
    %c0_1 = arith.constant 0 : index
    %c0_2 = arith.constant 0 : index
    %1 = vector.load %arg1[%c0_1, %c0_2] : memref<256x128xf32, #tpu.memory_space<vmem>>, vector<256x128xf32>
    %cst = arith.constant dense<0.000000e+00> : vector<2x128xf32>
    %2 = tpu.matmul %0, %1, %cst {dimension_numbers = #tpu.dot_dimension_numbers<[1], [0], [0], [1], [0, 0, 1, 1], [], []>} : vector<2x256xf32>, vector<256x128xf32>, vector<2x128xf32> -> vector<2x128xf32>
    %c0_3 = arith.constant 0 : index
    %c0_4 = arith.constant 0 : index
    %3 = vector.load %arg2[%c0_3, %c0_4] : memref<1x128xf32, #tpu.memory_space<vmem>>, vector<1x128xf32>
    %4 = vector.broadcast %3 : vector<1x128xf32> to vector<2x128xf32>
    %5 = arith.addf %2, %4 : vector<2x128xf32>
    %c0_5 = arith.constant 0 : index
    %c0_6 = arith.constant 0 : index
    %6 = vector.load %arg3[%c0_5, %c0_6] : memref<2x128xf32, #tpu.memory_space<vmem>>, vector<2x128xf32>
    tpu.vector_store %arg3[%c0_5, %c0_6], %5 {strides = array<i32>} : memref<2x128xf32, #tpu.memory_space<vmem>>, vector<2x128xf32>,
    return
  }
}

</mosaic_0001>

<bundles_post_ra>
// kernel: action_encoder_forward.1
= control target key start
LH: loop header
LB: loop body
LE: loop exit
PB: predicated region body
PF: predicated region fallthrough
CT: control target
= control target key end

     0   :  { %8 = vsyncpa [#allocation3], 0  ;;  %s396_s0 = inlined_call_operand.hbm [shape: f32[2,256], index: 0, kind: input, shape index: {}]   ;;  %s397_s1 = inlined_call_operand.hbm [shape: f32[256,128], index: 1, kind: input, shape index: {}]   ;;  %s398_s2 = inlined_call_operand.vmem [shape: f32[1,128], index: 2, kind: input, shape index: {}]   ;;  %s399_s3 = inlined_call_operand.hbm [shape: f32[2,128], index: 3, kind: output, shape index: {}]  }
   0x1   :  { %9 = vsyncpa [#allocation6], 0 }
   0x2   :  { %10 = vsyncpa [#allocation4], 0  ;;  %s325_s12 = smov [#allocation2]   ;;  %s326_s14 = smov [#allocation5]  }
   0x3   :  { %s17_s13 = sshll.u32 %s325_s12, 4  ;;  %s26_s15 = sshll.u32 %s326_s14, 4  ;;  %s18_s13 = int_to_ptr.vmem [resolvable:$true] %s17_s13  ;;  %s350_s15 = int_to_ptr.vmem [resolvable:$true] %s26_s15 }
   0x4   :  { %s253_s18 = scalar_lea.hbm %s396_s0, 64 }
   0x5   :  { %p254_p0 = scmp.ne.s32.totalorder %s396_s0, %s253_s18  ;;  %p257_p1 = scmp.lt.u32.totalorder %s253_s18, %s396_s0 }
   0x7   :  { %p259_p2 = pnand %p257_p1, %p254_p0 }
   0x9   :  { %262 = shalt.err (!%p259_p2)
}
   0xa   :  { %s263_s23 = scalar_lea.vmem %s18_s13, 64  ;;  %p268_p4 = scmp.lt.s32.totalorder %s18_s13, %s18_s13 }
   0xb   :  { %p264_p3 = scmp.ne.s32.totalorder %s18_s13, %s263_s23  ;;  %p269_p5 = scmp.lt.s32.totalorder %s263_s23, %s263_s23 }
   0xd   :  { %p270_p6 = por %p269_p5, %p268_p4 }
   0xf   :  { %p271_p7 = pnand %p270_p6, %p264_p3 }
  0x11   :  { %274 = shalt.err (!%p271_p7)
}
  0x12   :  { %20 = dma.hbm_to_vmem [thread:$0]  %s396_s0, 64, %s18_s13, [#allocation3]  }
  0x13   :  { %s275_s28 = scalar_lea.hbm %s397_s1, 4096 }
  0x14   :  { %p276_p8 = scmp.ne.s32.totalorder %s397_s1, %s275_s28  ;;  %p279_p9 = scmp.lt.u32.totalorder %s275_s28, %s397_s1 }
  0x16   :  { %p281_p10 = pnand %p279_p9, %p276_p8 }
  0x18   :  { %284 = shalt.err (!%p281_p10)
}
  0x19   :  { %s285_s6 = scalar_lea.vmem %s350_s15, 4096  ;;  %p290_p12 = scmp.lt.s32.totalorder %s350_s15, %s350_s15 }
  0x1a   :  { %p286_p11 = scmp.ne.s32.totalorder %s350_s15, %s285_s6  ;;  %p291_p13 = scmp.lt.s32.totalorder %s285_s6, %s285_s6 }
  0x1c   :  { %p292_p0 = por %p291_p13, %p290_p12 }
  0x1e   :  { %p293_p1 = pnand %p292_p0, %p286_p11 }
  0x20   :  { %296 = shalt.err (!%p293_p1)
}
  0x21   :  { %s327_s0 = smov 128   ;;  %s328_s7 = smov 8  }
  0x22   :  { %32 = dma.hbm_to_vmem [thread:$0]  %s397_s1, 4096, %s350_s15, [#allocation6], %s327_s0, %s327_s0, %s328_s7  }
  0x23   :  { %319 = dma.done.wait [#allocation3], 64  }
  0x24   :  { %320 = vsyncadd [#allocation3], 4294967232 }
  0x25   :  { %321 = dma.done.wait [#allocation6], 4096  }
  0x26   :  { %322 = vsyncadd [#allocation6], 4294963200  ;;  %v58_v0 = vld [vmem:[#allocation5 + $0x80] sm:$0xff]  ;;  %v59_v1 = vld [vmem:[#allocation5 + $0x88] sm:$0xff]  ;;  %s329_s11 = smov [#allocation7]  }
  0x27   :  { %v42_v2 = vld [vmem:[#allocation5] sm:$0xff]  ;;  %v216_v3 = vpack.c.bf16 %v59_v1, %v58_v0  ;;  %v43_v4 = vld [vmem:[#allocation5 + $0x8] sm:$0xff]  ;;  %v60_v5 = vld [vmem:[#allocation5 + $0x90] sm:$0xff]  ;;  %s169_s12 = sshll.u32 %s329_s11, 4  ;;  %s170_s12 = int_to_ptr.vmem [resolvable:$true] %s169_s12 }
  0x28   :  { %v61_v6 = vld [vmem:[#allocation5 + $0x98] sm:$0xff]  ;;  %v218_v7 = vpack.c.bf16 %v43_v4, %v42_v2  ;;  %v44_v9 = vld [vmem:[#allocation5 + $0x10] sm:$0xff]  ;;  %v62_v11 = vld [vmem:[#allocation5 + $0xa0] sm:$0xff]  ;;  %s297_s13 = scalar_lea.vmem %s170_s12, 32  ;;  %p302_p3 = scmp.lt.s32.totalorder %s170_s12, %s170_s12 }
  0x29   :  { %v220_v8 = vpack.c.bf16 %v61_v6, %v60_v5  ;;  %v45_v10 = vld [vmem:[#allocation5 + $0x18] sm:$0xff]  ;;  %217 = vmatprep.subr.bf16.mxu0 %v216_v3  ;;  %v63_v12 = vld [vmem:[#allocation5 + $0xa8] sm:$0xff]  ;;  %v46_v15 = vld [vmem:[#allocation5 + $0x20] sm:$0xff]  ;;  %p298_p2 = scmp.ne.s32.totalorder %s170_s12, %s297_s13  ;;  %p303_p4 = scmp.lt.s32.totalorder %s297_s13, %s297_s13 }
  0x2a   :  { %219 = vmatpush3.bf16.msra.mxu0 %v218_v7  ;;  %v222_v13 = vpack.c.bf16 %v45_v10, %v44_v9  ;;  %v224_v14 = vpack.c.bf16 %v63_v12, %v62_v11  ;;  %v47_v16 = vld [vmem:[#allocation5 + $0x28] sm:$0xff]  ;;  %v64_v17 = vld [vmem:[#allocation5 + $0xb0] sm:$0xff]  ;;  %v65_v18 = vld [vmem:[#allocation5 + $0xb8] sm:$0xff] }
  0x2b   :  { %221 = vmatprep.subr.bf16.mxu0 %v220_v8  ;;  %v226_v19 = vpack.c.bf16 %v47_v16, %v46_v15  ;;  %v228_v20 = vpack.c.bf16 %v65_v18, %v64_v17  ;;  %v48_v21 = vld [vmem:[#allocation5 + $0x30] sm:$0xff]  ;;  %v49_v22 = vld [vmem:[#allocation5 + $0x38] sm:$0xff]  ;;  %v66_v23 = vld [vmem:[#allocation5 + $0xc0] sm:$0xff]  ;;  %p304_p5 = por %p303_p4, %p302_p3 }
  0x2c   :  { %v67_v24 = vld [vmem:[#allocation5 + $0xc8] sm:$0xff]  ;;  %v180_v25 = vld.sshfl [vmem:[#allocation2] sm:$0x33 pattern:$0x76325410]  ;;  %v230_v27 = vpack.c.bf16 %v49_v22, %v48_v21  ;;  %v50_v29 = vld [vmem:[#allocation5 + $0x40] sm:$0xff] }
  0x2d   :  { %v89_v26 = vcombine.high %v180_v25, %v180_v25  ;;  %v232_v28 = vpack.c.bf16 %v67_v24, %v66_v23  ;;  %v51_v30 = vld [vmem:[#allocation5 + $0x48] sm:$0xff]  ;;  %v68_v31 = vld [vmem:[#allocation5 + $0xd0] sm:$0xff]  ;;  %v69_v32 = vld [vmem:[#allocation5 + $0xd8] sm:$0xff]  ;;  %p305_p6 = pnand %p304_p5, %p298_p2 }
  0x2e   :  { %223 = vmatpush3.bf16.msra.mxu0 %v222_v13  ;;  %v234_v33 = vpack.c.bf16 %v51_v30, %v50_v29  ;;  %v236_v34 = vpack.c.bf16 %v69_v32, %v68_v31  ;;  %v52_v35 = vld [vmem:[#allocation5 + $0x50] sm:$0xff]  ;;  %v53_v36 = vld [vmem:[#allocation5 + $0x58] sm:$0xff]  ;;  %v70_v37 = vld [vmem:[#allocation5 + $0xe0] sm:$0xff] }
  0x2f   :  { %225 = vmatprep.subr.bf16.mxu0 %v224_v14  ;;  %156 = vmatprep.mubr.f32.mxu0 %v89_v26  ;;  %v71_v38 = vld [vmem:[#allocation5 + $0xe8] sm:$0xff]  ;;  %v238_v39 = vpack.c.bf16 %v53_v36, %v52_v35  ;;  %v54_v41 = vld [vmem:[#allocation5 + $0x60] sm:$0xff]  ;;  %v72_v43 = vld [vmem:[#allocation5 + $0xf0] sm:$0xff] }
  0x30   :  { %v240_v40 = vpack.c.bf16 %v71_v38, %v70_v37  ;;  %v55_v42 = vld [vmem:[#allocation5 + $0x68] sm:$0xff]  ;;  %v73_v44 = vld [vmem:[#allocation5 + $0xf8] sm:$0xff]  ;;  %v56_v47 = vld [vmem:[#allocation5 + $0x70] sm:$0xff] }
  0x31   :  { %v242_v45 = vpack.c.bf16 %v55_v42, %v54_v41  ;;  %v244_v46 = vpack.c.bf16 %v73_v44, %v72_v43  ;;  %v57_v48 = vld [vmem:[#allocation5 + $0x78] sm:$0xff] }
  0x32   :  { %227 = vmatpush3.bf16.msra.mxu0 %v226_v19  ;;  %v246_v49 = vpack.c.bf16 %v57_v48, %v56_v47  ;;  %v179_v51 = vld [vmem:[%s398_s2] ss:$0 sm:$0xff] }
  0x33   :  { %229 = vmatprep.subr.bf16.mxu0 %v228_v20 }
  0x36   :  { %231 = vmatpush3.bf16.msra.mxu0 %v230_v27 }
  0x37   :  { %233 = vmatprep.subr.bf16.mxu0 %v232_v28 }
  0x3a   :  { %235 = vmatpush3.bf16.msra.mxu0 %v234_v33 }
  0x3b   :  { %237 = vmatprep.subr.bf16.mxu0 %v236_v34 }
  0x3e   :  { %239 = vmatpush3.bf16.msra.mxu0 %v238_v39 }
  0x3f   :  { %241 = vmatprep.subr.bf16.mxu0 %v240_v40 }
  0x42   :  { %243 = vmatpush3.bf16.msra.mxu0 %v242_v45 }
  0x43   :  { %245 = vmatprep.subr.bf16.mxu0 %v244_v46 }
  0x46   :  { %247 = vmatpush3.bf16.msra.mxu0 %v246_v49 }
  0x49   :  { %157 = vmatmul.mubr.f32.vlgmr.msra.gmra.mrb[0].mxu0 %v180_v25 }
 0x11c   :  { %v213_v50 = vpop.f32.mrb[0].mxu0 }
 0x11d   :  { %v214_v52 = vpop.f32.mrb[1].mxu0 }
 0x11e   :  { %v215_v53 = vadd.f32 %v214_v52, %v213_v50 }
 0x120   :  { %v159_v54 = vadd.f32 %v215_v53, %v179_v51 }
 0x122   :  { %162 = vst [vmem:[#allocation7] sm:$0x3] %v159_v54 }
 0x123   :  { %308 = shalt.err (!%p305_p6)
}
 0x124   :  { %s309_s16 = scalar_lea.hbm %s399_s3, 32 }
 0x125   :  { %p310_p7 = scmp.ne.s32.totalorder %s399_s3, %s309_s16  ;;  %p313_p8 = scmp.lt.u32.totalorder %s309_s16, %s399_s3 }
 0x127   :  { %p315_p9 = pnand %p313_p8, %p310_p7 }
 0x129   :  { %318 = shalt.err (!%p315_p9)
}
 0x12a   :  { %172 = dma.vmem_to_hbm [thread:$0]  %s170_s12, 32, %s399_s3, [#allocation4]  }
 0x12b   :  { %323 = dma.done.wait [#allocation4], 32  }
 0x12c   :  { %324 = vsyncadd [#allocation4], 4294967264 }
 0x12d   :  { %176 = vsyncpa [#allocation3], 1 }
 0x12e   :  { %177 = vsyncpa [#allocation6], 1 }
 0x12f   :  { %178 = vsyncpa [#allocation4], 1 }

</bundles_post_ra>
